<compile_context>
chip_gen: v5e
topology: v5e:2x2
jax: 0.10.0
libtpu: 0.0.40
codegen_flags: <defaults>
</compile_context>

<pallas_src>
import jax
import jax.numpy as jnp
import numpy as np
from jax.experimental import pallas as pl
from jax.experimental.pallas import tpu as pltpu

# ---- LyapunovLoss.__init__ defaults, baked as compile-time constants ----
RHO = 1.0
MARGIN = 0.0
MARGIN_ADV = 0.0
MARGIN_RHO = 1.0
KAPPA_ADV = 0.0            # kappa_adv (== 0 -> "scale" branch in empirical loss)
RHO_RATIO = 1.0
LOSS_X_NEXT_WEIGHT = 1.0
LOSS_RHO_CLIP = True
LOSS_RHO_SORTED = False
NORMALIZE = False
LOSS_MAX = False


# ----------------------------- Pallas kernels -----------------------------

def _empirical_kernel(y_ref, out_ref):
    """y_ref: (C, N, B) f32, channels-first, batch on lanes.
    out_ref: (4, B) f32 slab: rows = [loss, inside, safe, safe_violation]."""
    C = y_ref.shape[0]
    ch = [y_ref[k] for k in range(C)]                 # each (N, B), loaded once
    lyap = -ch[0]                                     # (N, B)

    # safety bookkeeping (unrolled AND over violation channels -> pure VPU)
    safe_v = ch[1] <= 0.0
    for k in range(2, C):
        safe_v = jnp.logical_and(safe_v, ch[k] <= 0.0)
    inside0 = lyap <= RHO
    safe = jnp.logical_or(jnp.logical_not(inside0), safe_v)

    # loss terms
    inside = lyap <= RHO * (1.0 + MARGIN_RHO)
    v_V = ch[1]
    if KAPPA_ADV != 0.0:
        v_V = v_V + lyap * KAPPA_ADV
    v_next = jnp.zeros_like(lyap)
    for k in range(2, C):
        v_next = v_next + jnp.maximum(ch[k], 0.0)

    if KAPPA_ADV > 0.0:
        v_V = jnp.maximum(v_V, 0.0)
    else:
        # kappa_adv == 0 -> normalized-by-scale branch of the torch module
        scale = jnp.clip(lyap, 1e-8, 1.0)
        v_V = jnp.maximum(v_V + MARGIN_ADV * scale, 0.0) / scale

    next_in = v_next <= 0.0
    v_V = jnp.where(next_in, v_V, jnp.maximum(v_V, RHO - lyap))

    loss_nb = jnp.where(inside, v_V + v_next * LOSS_X_NEXT_WEIGHT, 0.0)  # (N, B)

    out_ref[0:1, :] = jnp.sum(loss_nb, axis=0, keepdims=True)
    out_ref[1:2, :] = jnp.any(inside, axis=0, keepdims=True).astype(jnp.float32)
    out_ref[2:3, :] = jnp.all(safe, axis=0, keepdims=True).astype(jnp.float32)
    out_ref[3:4, :] = jnp.all(safe_v, axis=0, keepdims=True).astype(jnp.float32)


def _rho_kernel(y0_ref, loss_ref, inside_ref):
    """y0_ref: (1, B) holding y[:, 0] (only channel the rho loss needs)."""
    lyap = -y0_ref[...]                               # (1, B)
    inside = lyap <= RHO
    inside_ref[...] = inside.astype(jnp.float32)

    B = y0_ref.shape[1]
    rho_viol = jnp.maximum(lyap - RHO, 0.0)
    mean_viol = jnp.sum(rho_viol) / jnp.float32(B)
    # TODO(synk): loss_rho_sorted=True path (torch.sort + partial mean) is not
    # implemented in-kernel; guarded at the wrapper level.
    if LOSS_RHO_CLIP:
        # Integer-count test: equivalent to `mean(inside) >= RHO_RATIO` but robust
        # to fp rounding of the mean for non-power-of-two batch sizes.
        n_inside = jnp.sum(inside.astype(jnp.float32))
        loss = jnp.where(n_inside >= jnp.float32(RHO_RATIO * B),
                         jnp.float32(0.0), mean_viol)
    else:
        loss = mean_viol
    loss_ref[0] = loss


def _verified_kernel(*refs):
    """y_ref: (C, B) channels-first.  y_M is only passed (and DMA'd) when
    NORMALIZE is True (compile-time constant).
    out_ref: (4, B) slab [loss, inside, safe, safe_violation]; maxviol_ref: (1,)."""
    if NORMALIZE:
        y_ref, ym_ref, out_ref, maxviol_ref = refs
    else:
        y_ref, out_ref, maxviol_ref = refs
        ym_ref = None

    C = y_ref.shape[0]
    ch = [y_ref[k:k + 1, :] for k in range(C)]        # each (1, B)
    lyap = -ch[0]                                     # (1, B)

    safe_v = ch[1] <= 0.0
    for k in range(2, C):
        safe_v = jnp.logical_and(safe_v, ch[k] <= 0.0)
    inside0 = lyap <= RHO
    safe = jnp.logical_or(jnp.logical_not(inside0), safe_v)

    # sum of relu over channels 2..C-1 (x_next violations) and over all (for max)
    v_next = jnp.zeros_like(lyap)
    for k in range(2, C):
        v_next = v_next + jnp.maximum(ch[k], 0.0)
    relu_sum = jnp.maximum(ch[1], 0.0) + v_next
    maxviol_ref[0] = jnp.max(jnp.where(inside0, relu_sum, 0.0))

    inside = lyap <= RHO * (1.0 + MARGIN_RHO)
    v_V = ch[1]
    if NORMALIZE:
        scale = jnp.clip(-ym_ref[0:1, :], 1e-8, 1.0)
        v_V = jnp.maximum(v_V + MARGIN * scale, 0.0) / scale
    else:
        v_V = jnp.maximum(v_V + MARGIN, 0.0)

    next_in = v_next <= 0.0
    if LOSS_MAX:
        v_V = jnp.where(next_in, v_V, jnp.maximum(v_V, RHO - lyap))
    else:
        v_V = jnp.where(next_in, v_V, jnp.float32(RHO))

    loss = jnp.where(inside, v_V + v_next * LOSS_X_NEXT_WEIGHT, 0.0)

    out_ref[0:1, :] = loss
    out_ref[1:2, :] = inside.astype(jnp.float32)
    out_ref[2:3, :] = safe.astype(jnp.float32)
    out_ref[3:4, :] = safe_v.astype(jnp.float32)


# ------------------------------ wrappers ------------------------------

def _vmem():
    return pl.BlockSpec(memory_space=pltpu.MemorySpace.VMEM)


def _smem():
    return pl.BlockSpec(memory_space=pltpu.MemorySpace.SMEM)


def empirical_loss(y):
    B, N, C = y.shape
    y_t = jnp.transpose(y, (2, 1, 0))                 # (C, N, B): batch on lanes
    out = pl.pallas_call(
        _empirical_kernel,
        out_shape=jax.ShapeDtypeStruct((4, B), jnp.float32),
        in_specs=[_vmem()],
        out_specs=_vmem(),
    )(y_t)
    return {'loss': out[0], 'inside': out[1] > 0.5,
            'safe': out[2] > 0.5, 'safe_violation': out[3] > 0.5}


def rho_loss(y):
    if LOSS_RHO_SORTED:
        # TODO(synk): loss_rho_sorted=True (sorted partial mean) not implemented.
        raise NotImplementedError("loss_rho_sorted=True path is not implemented")
    B = y.shape[0]
    y0 = y[:, 0][None, :]                             # (1, B): only channel 0 needed
    loss, inside = pl.pallas_call(
        _rho_kernel,
        out_shape=(
            jax.ShapeDtypeStruct((1,), jnp.float32),  # loss (scalar, SMEM)
            jax.ShapeDtypeStruct((1, B), jnp.float32),  # inside
        ),
        in_specs=[_vmem()],
        out_specs=(_smem(), _vmem()),
    )(y0)
    return {'loss': loss[0], 'inside': inside[0] > 0.5}


def verified_loss(y, y_M):
    B, C = y.shape
    y_t = y.T                                         # (C, B): batch on lanes
    if NORMALIZE:
        inputs = (y_t, y_M.T)
        in_specs = [_vmem(), _vmem()]
    else:
        # y_M is dead code under NORMALIZE=False: do not DMA it at all.
        inputs = (y_t,)
        in_specs = [_vmem()]
    out, maxv = pl.pallas_call(
        _verified_kernel,
        out_shape=(
            jax.ShapeDtypeStruct((4, B), jnp.float32),  # [loss, inside, safe, safe_v]
            jax.ShapeDtypeStruct((1,), jnp.float32),    # max_violation (scalar, SMEM)
        ),
        in_specs=in_specs,
        out_specs=(_vmem(), _smem()),
    )(*inputs)
    return {'loss': out[0], 'inside': out[1] > 0.5, 'safe': out[2] > 0.5,
            'safe_violation': out[3] > 0.5, 'max_violation': maxv[0]}


class LyapunovLossPallas:
    """JAX/Pallas port of LyapunovLoss (defaults of the torch __init__)."""

    def __init__(self, valid_lower, valid_upper):
        self.valid_lower = valid_lower
        self.valid_upper = valid_upper
        self.x_dim = valid_lower.shape[-1]
        self.adv_dim = 2 * self.x_dim + 1
        # deterministic adv_mapping init (identity on the diagonal), unused in forward
        idx = jnp.arange(self.adv_dim)
        self.adv_mapping = jnp.zeros(
            (self.adv_dim, self.adv_dim, self.adv_dim), jnp.float32
        ).at[idx, idx, idx].set(1.0)

    def forward(self, loss_term, y=None, y_M=None):
        if loss_term == 'empirical':
            return empirical_loss(y)
        elif loss_term == 'rho':
            return rho_loss(y)
        elif loss_term == 'verified':
            return verified_loss(y, y_M)
        else:
            raise NameError(loss_term)


# ------------------------- plain-JAX references -------------------------

def _ref_empirical(y):
    lyap = -y[:, :, 0]
    viol = y[:, :, 1:]
    inside0 = lyap <= RHO
    sv = jnp.all(viol <= 0, axis=-1)
    safe = jnp.all(jnp.logical_or(~inside0, sv), axis=-1)
    sv_all = jnp.all(sv, axis=-1)
    inside = lyap <= RHO * (1 + MARGIN_RHO)
    v_V = viol[:, :, 0] + lyap * KAPPA_ADV
    v_next = jnp.sum(jax.nn.relu(viol[:, :, 1:]), axis=-1)
    scale = jnp.clip(lyap, 1e-8, 1.0)
    v_V = jax.nn.relu(v_V + MARGIN_ADV * scale) / scale
    next_in = v_next <= 0
    v_V = jnp.where(next_in, v_V, jnp.maximum(v_V, RHO - lyap))
    loss = jnp.sum(inside * (v_V + v_next * LOSS_X_NEXT_WEIGHT), axis=-1)
    return {'loss': loss, 'inside': jnp.any(inside, -1),
            'safe': safe, 'safe_violation': sv_all}


def _ref_rho(y):
    lyap = -y[:, 0]
    inside = lyap <= RHO
    rho_viol = jax.nn.relu(lyap - RHO)
    loss = jnp.where(jnp.mean(inside.astype(jnp.float32)) >= RHO_RATIO,
                     0.0, jnp.mean(rho_viol))
    return {'loss': loss, 'inside': inside}


def _ref_verified(y, y_M):
    lyap = -y[:, 0]
    viol = y[:, 1:]
    inside0 = lyap <= RHO
    sv = jnp.all(viol <= 0, axis=-1)
    safe = jnp.logical_or(~inside0, sv)
    max_viol = jnp.max(inside0 * jnp.sum(jax.nn.relu(viol), axis=-1))
    inside = lyap <= RHO * (1 + MARGIN_RHO)
    v_V = jax.nn.relu(viol[:, 0] + MARGIN)
    v_next = jnp.sum(jax.nn.relu(viol[:, 1:]), axis=-1)
    next_in = v_next <= 0
    v_V = next_in * v_V + (~next_in) * RHO
    loss = inside * (v_V + v_next * LOSS_X_NEXT_WEIGHT)
    return {'loss': loss, 'inside': inside, 'safe': safe,
            'safe_violation': sv, 'max_violation': max_viol}


# --------------------------------- main ---------------------------------

if __name__ == "__main__":
    key = jax.random.PRNGKey(0)
    x_dim = 2
    valid_lower = -jnp.ones((x_dim,), jnp.float32)
    valid_upper = jnp.ones((x_dim,), jnp.float32)
    mod = LyapunovLossPallas(valid_lower, valid_upper)

    k1, k2, k3, k4 = jax.random.split(key, 4)
    B, N, C = 2, mod.adv_dim, 1 + mod.adv_dim        # [2, 5, 6]
    y_emp = jax.random.normal(k1, (B, N, C), jnp.float32)
    y_rho = jax.random.normal(k2, (8, C), jnp.float32)
    y_ver = jax.random.normal(k3, (8, C), jnp.float32)
    y_M = jax.random.normal(k4, (8, C), jnp.float32)

    emp = mod.forward('empirical', y=y_emp)
    rho = mod.forward('rho', y=y_rho)
    ver = mod.forward('verified', y=y_ver, y_M=y_M)
    jax.block_until_ready((emp, rho, ver))

    # sanity check against the plain-JAX reference of the same math
    ref_e, ref_r, ref_v = _ref_empirical(y_emp), _ref_rho(y_rho), _ref_verified(y_ver, y_M)
    assert np.allclose(np.asarray(emp['loss']), np.asarray(ref_e['loss']), atol=1e-5)
    assert np.array_equal(np.asarray(emp['inside']), np.asarray(ref_e['inside']))
    assert np.array_equal(np.asarray(emp['safe']), np.asarray(ref_e['safe']))
    assert np.array_equal(np.asarray(emp['safe_violation']),
                          np.asarray(ref_e['safe_violation']))
    assert np.allclose(np.asarray(rho['loss']), np.asarray(ref_r['loss']), atol=1e-5)
    assert np.array_equal(np.asarray(rho['inside']), np.asarray(ref_r['inside']))
    assert np.allclose(np.asarray(ver['loss']), np.asarray(ref_v['loss']), atol=1e-5)
    assert np.allclose(np.asarray(ver['max_violation']),
                       np.asarray(ref_v['max_violation']), atol=1e-5)
    assert np.array_equal(np.asarray(ver['inside']), np.asarray(ref_v['inside']))
    assert np.array_equal(np.asarray(ver['safe']), np.asarray(ref_v['safe']))
    assert np.array_equal(np.asarray(ver['safe_violation']),
                          np.asarray(ref_v['safe_violation']))

    print("KERNEL_OK")
</pallas_src>

<mosaic_0001>
module attributes {stable_mosaic.version = 11 : i64} {
  func.func @_empirical_kernel(%arg0: memref<6x5x2xf32, #tpu.memory_space<vmem>>, %arg1: memref<4x2xf32, #tpu.memory_space<vmem>>) attributes {dimension_semantics = [], scalar_prefetch = 0 : i64, scratch_operands = 0 : i64, tpu.core_type = #tpu.core_type<tc>} {
    %c0 = arith.constant 0 : index
    %c0_0 = arith.constant 0 : index
    %c0_1 = arith.constant 0 : index
    %0 = vector.load %arg0[%c0, %c0_0, %c0_1] : memref<6x5x2xf32, #tpu.memory_space<vmem>>, vector<1x5x2xf32>
    %1 = vector.shape_cast %0 : vector<1x5x2xf32> to vector<5x2xf32>
    %c1 = arith.constant 1 : index
    %c0_2 = arith.constant 0 : index
    %c0_3 = arith.constant 0 : index
    %2 = vector.load %arg0[%c1, %c0_2, %c0_3] : memref<6x5x2xf32, #tpu.memory_space<vmem>>, vector<1x5x2xf32>
    %3 = vector.shape_cast %2 : vector<1x5x2xf32> to vector<5x2xf32>
    %c2 = arith.constant 2 : index
    %c0_4 = arith.constant 0 : index
    %c0_5 = arith.constant 0 : index
    %4 = vector.load %arg0[%c2, %c0_4, %c0_5] : memref<6x5x2xf32, #tpu.memory_space<vmem>>, vector<1x5x2xf32>
    %5 = vector.shape_cast %4 : vector<1x5x2xf32> to vector<5x2xf32>
    %c3 = arith.constant 3 : index
    %c0_6 = arith.constant 0 : index
    %c0_7 = arith.constant 0 : index
    %6 = vector.load %arg0[%c3, %c0_6, %c0_7] : memref<6x5x2xf32, #tpu.memory_space<vmem>>, vector<1x5x2xf32>
    %7 = vector.shape_cast %6 : vector<1x5x2xf32> to vector<5x2xf32>
    %c4 = arith.constant 4 : index
    %c0_8 = arith.constant 0 : index
    %c0_9 = arith.constant 0 : index
    %8 = vector.load %arg0[%c4, %c0_8, %c0_9] : memref<6x5x2xf32, #tpu.memory_space<vmem>>, vector<1x5x2xf32>
    %9 = vector.shape_cast %8 : vector<1x5x2xf32> to vector<5x2xf32>
    %c5 = arith.constant 5 : index
    %c0_10 = arith.constant 0 : index
    %c0_11 = arith.constant 0 : index
    %10 = vector.load %arg0[%c5, %c0_10, %c0_11] : memref<6x5x2xf32, #tpu.memory_space<vmem>>, vector<1x5x2xf32>
    %11 = vector.shape_cast %10 : vector<1x5x2xf32> to vector<5x2xf32>
    %cst = arith.constant 0.000000e+00 : f32
    %12 = vector.broadcast %cst : f32 to vector<5x2xf32>
    %13 = arith.subf %12, %1 : vector<5x2xf32>
    %cst_12 = arith.constant 0.000000e+00 : f32
    %14 = vector.broadcast %cst_12 : f32 to vector<5x2xf32>
    %15 = arith.cmpf ole, %3, %14 : vector<5x2xf32>
    %cst_13 = arith.constant 0.000000e+00 : f32
    %16 = vector.broadcast %cst_13 : f32 to vector<5x2xf32>
    %17 = arith.cmpf ole, %5, %16 : vector<5x2xf32>
    %18 = arith.andi %15, %17 : vector<5x2xi1>
    %cst_14 = arith.constant 0.000000e+00 : f32
    %19 = vector.broadcast %cst_14 : f32 to vector<5x2xf32>
    %20 = arith.cmpf ole, %7, %19 : vector<5x2xf32>
    %21 = arith.andi %18, %20 : vector<5x2xi1>
    %cst_15 = arith.constant 0.000000e+00 : f32
    %22 = vector.broadcast %cst_15 : f32 to vector<5x2xf32>
    %23 = arith.cmpf ole, %9, %22 : vector<5x2xf32>
    %24 = arith.andi %21, %23 : vector<5x2xi1>
    %cst_16 = arith.constant 0.000000e+00 : f32
    %25 = vector.broadcast %cst_16 : f32 to vector<5x2xf32>
    %26 = arith.cmpf ole, %11, %25 : vector<5x2xf32>
    %27 = arith.andi %24, %26 : vector<5x2xi1>
    %cst_17 = arith.constant 1.000000e+00 : f32
    %28 = vector.broadcast %cst_17 : f32 to vector<5x2xf32>
    %29 = arith.cmpf ole, %13, %28 : vector<5x2xf32>
    %cst_18 = arith.constant dense<true> : vector<5x2xi1>
    %30 = arith.xori %29, %cst_18 : vector<5x2xi1>
    %31 = arith.ori %30, %27 : vector<5x2xi1>
    %cst_19 = arith.constant 2.000000e+00 : f32
    %32 = vector.broadcast %cst_19 : f32 to vector<5x2xf32>
    %33 = arith.cmpf ole, %13, %32 : vector<5x2xf32>
    %cst_20 = arith.constant 0.000000e+00 : f32
    %34 = vector.broadcast %cst_20 : f32 to vector<5x2xf32>
    %cst_21 = arith.constant 0.000000e+00 : f32
    %35 = vector.broadcast %cst_21 : f32 to vector<5x2xf32>
    %36 = arith.maximumf %5, %35 : vector<5x2xf32>
    %37 = arith.addf %34, %36 : vector<5x2xf32>
    %cst_22 = arith.constant 0.000000e+00 : f32
    %38 = vector.broadcast %cst_22 : f32 to vector<5x2xf32>
    %39 = arith.maximumf %7, %38 : vector<5x2xf32>
    %40 = arith.addf %37, %39 : vector<5x2xf32>
    %cst_23 = arith.constant 0.000000e+00 : f32
    %41 = vector.broadcast %cst_23 : f32 to vector<5x2xf32>
    %42 = arith.maximumf %9, %41 : vector<5x2xf32>
    %43 = arith.addf %40, %42 : vector<5x2xf32>
    %cst_24 = arith.constant 0.000000e+00 : f32
    %44 = vector.broadcast %cst_24 : f32 to vector<5x2xf32>
    %45 = arith.maximumf %11, %44 : vector<5x2xf32>
    %46 = arith.addf %43, %45 : vector<5x2xf32>
    %cst_25 = arith.constant 9.99999993E-9 : f32
    %cst_26 = arith.constant 1.000000e+00 : f32
    %47 = vector.broadcast %cst_25 : f32 to vector<5x2xf32>
    %48 = arith.maximumf %47, %13 : vector<5x2xf32>
    %49 = vector.broadcast %cst_26 : f32 to vector<5x2xf32>
    %50 = arith.minimumf %49, %48 : vector<5x2xf32>
    %cst_27 = arith.constant 0.000000e+00 : f32
    %51 = vector.broadcast %cst_27 : f32 to vector<5x2xf32>
    %52 = arith.mulf %51, %50 : vector<5x2xf32>
    %53 = arith.addf %3, %52 : vector<5x2xf32>
    %cst_28 = arith.constant 0.000000e+00 : f32
    %54 = vector.broadcast %cst_28 : f32 to vector<5x2xf32>
    %55 = arith.maximumf %53, %54 : vector<5x2xf32>
    %56 = arith.divf %55, %50 : vector<5x2xf32>
    %cst_29 = arith.constant 0.000000e+00 : f32
    %57 = vector.broadcast %cst_29 : f32 to vector<5x2xf32>
    %58 = arith.cmpf ole, %46, %57 : vector<5x2xf32>
    %cst_30 = arith.constant 1.000000e+00 : f32
    %59 = vector.broadcast %cst_30 : f32 to vector<5x2xf32>
    %60 = arith.subf %59, %13 : vector<5x2xf32>
    %61 = arith.maximumf %56, %60 : vector<5x2xf32>
    %62 = arith.select %58, %56, %61 : vector<5x2xi1>, vector<5x2xf32>
    %cst_31 = arith.constant 1.000000e+00 : f32
    %63 = vector.broadcast %cst_31 : f32 to vector<5x2xf32>
    %64 = arith.mulf %46, %63 : vector<5x2xf32>
    %65 = arith.addf %62, %64 : vector<5x2xf32>
    %cst_32 = arith.constant 0.000000e+00 : f32
    %66 = vector.broadcast %cst_32 : f32 to vector<5x2xf32>
    %67 = arith.select %33, %65, %66 : vector<5x2xi1>, vector<5x2xf32>
    %cst_33 = arith.constant dense<0.000000e+00> : vector<2xf32>
    %68 = vector.multi_reduction <add>, %67, %cst_33 [0] : vector<5x2xf32> to vector<2xf32>
    %69 = vector.shape_cast %68 : vector<2xf32> to vector<1x2xf32>
    %c0_34 = arith.constant 0 : index
    %c0_35 = arith.constant 0 : index
    %70 = vector.load %arg1[%c0_34, %c0_35] : memref<4x2xf32, #tpu.memory_space<vmem>>, vector<1x2xf32>
    tpu.vector_store %arg1[%c0_34, %c0_35], %69 {strides = array<i32>} : memref<4x2xf32, #tpu.memory_space<vmem>>, vector<1x2xf32>,
    %cst_36 = arith.constant 1.000000e+00 : f32
    %cst_37 = arith.constant 0.000000e+00 : f32
    %71 = vector.broadcast %cst_36 : f32 to vector<5x2xf32>
    %72 = vector.broadcast %cst_37 : f32 to vector<5x2xf32>
    %73 = arith.select %33, %71, %72 : vector<5x2xi1>, vector<5x2xf32>
    %cst_38 = arith.constant dense<0xFF800000> : vector<2xf32>
    %74 = vector.multi_reduction <maximumf>, %73, %cst_38 [0] : vector<5x2xf32> to vector<2xf32>
    %cst_39 = arith.constant 0.000000e+00 : f32
    %75 = vector.broadcast %cst_39 : f32 to vector<2xf32>
    %76 = arith.cmpf ogt, %74, %75 : vector<2xf32>
    %77 = vector.shape_cast %76 : vector<2xi1> to vector<1x2xi1>
    %78 = arith.extui %77 : vector<1x2xi1> to vector<1x2xi32>
    %79 = arith.sitofp %78 : vector<1x2xi32> to vector<1x2xf32>
    %c1_40 = arith.constant 1 : index
    %c0_41 = arith.constant 0 : index
    %80 = vector.load %arg1[%c1_40, %c0_41] : memref<4x2xf32, #tpu.memory_space<vmem>>, vector<1x2xf32>
    tpu.vector_store %arg1[%c1_40, %c0_41], %79 {strides = array<i32>} : memref<4x2xf32, #tpu.memory_space<vmem>>, vector<1x2xf32>,
    %cst_42 = arith.constant 1.000000e+00 : f32
    %cst_43 = arith.constant 0.000000e+00 : f32
    %81 = vector.broadcast %cst_42 : f32 to vector<5x2xf32>
    %82 = vector.broadcast %cst_43 : f32 to vector<5x2xf32>
    %83 = arith.select %31, %81, %82 : vector<5x2xi1>, vector<5x2xf32>
    %cst_44 = arith.constant dense<0x7F800000> : vector<2xf32>
    %84 = vector.multi_reduction <minimumf>, %83, %cst_44 [0] : vector<5x2xf32> to vector<2xf32>
    %cst_45 = arith.constant 0.000000e+00 : f32
    %85 = vector.broadcast %cst_45 : f32 to vector<2xf32>
    %86 = arith.cmpf ogt, %84, %85 : vector<2xf32>
    %87 = vector.shape_cast %86 : vector<2xi1> to vector<1x2xi1>
    %88 = arith.extui %87 : vector<1x2xi1> to vector<1x2xi32>
    %89 = arith.sitofp %88 : vector<1x2xi32> to vector<1x2xf32>
    %c2_46 = arith.constant 2 : index
    %c0_47 = arith.constant 0 : index
    %90 = vector.load %arg1[%c2_46, %c0_47] : memref<4x2xf32, #tpu.memory_space<vmem>>, vector<1x2xf32>
    tpu.vector_store %arg1[%c2_46, %c0_47], %89 {strides = array<i32>} : memref<4x2xf32, #tpu.memory_space<vmem>>, vector<1x2xf32>,
    %cst_48 = arith.constant 1.000000e+00 : f32
    %cst_49 = arith.constant 0.000000e+00 : f32
    %91 = vector.broadcast %cst_48 : f32 to vector<5x2xf32>
    %92 = vector.broadcast %cst_49 : f32 to vector<5x2xf32>
    %93 = arith.select %27, %91, %92 : vector<5x2xi1>, vector<5x2xf32>
    %cst_50 = arith.constant dense<0x7F800000> : vector<2xf32>
    %94 = vector.multi_reduction <minimumf>, %93, %cst_50 [0] : vector<5x2xf32> to vector<2xf32>
    %cst_51 = arith.constant 0.000000e+00 : f32
    %95 = vector.broadcast %cst_51 : f32 to vector<2xf32>
    %96 = arith.cmpf ogt, %94, %95 : vector<2xf32>
    %97 = vector.shape_cast %96 : vector<2xi1> to vector<1x2xi1>
    %98 = arith.extui %97 : vector<1x2xi1> to vector<1x2xi32>
    %99 = arith.sitofp %98 : vector<1x2xi32> to vector<1x2xf32>
    %c3_52 = arith.constant 3 : index
    %c0_53 = arith.constant 0 : index
    %100 = vector.load %arg1[%c3_52, %c0_53] : memref<4x2xf32, #tpu.memory_space<vmem>>, vector<1x2xf32>
    tpu.vector_store %arg1[%c3_52, %c0_53], %99 {strides = array<i32>} : memref<4x2xf32, #tpu.memory_space<vmem>>, vector<1x2xf32>,
    return
  }
}

</mosaic_0001>

<bundles_post_ra>
// kernel: tpu_custom_call.1
= control target key start
LH: loop header
LB: loop body
LE: loop exit
PB: predicated region body
PF: predicated region fallthrough
CT: control target
= control target key end

     0   :  { %vm67_vm0 = vcmask 12288   ;;  %v129_v8 = vmov 0.0   ;;  %vm130_vm12 = vmmov 1   ;;  %s200_s0 = inlined_call_operand.vmem [shape: f32[6,5,2], index: 0, kind: input, shape index: {}]   ;;  %s201_s1 = inlined_call_operand.vmem [shape: f32[4,2], index: 1, kind: output, shape index: {}]  }
   0x1   :  { %v8_v0 = vld [vmem:[%s200_s0] sm:$0x1f]  ;;  %v117_v1 = vld [vmem:[%s200_s0 + $0x8] sm:$0x1f]  ;;  %v118_v2 = vld [vmem:[%s200_s0 + $0x10] sm:$0x1f] }
   0x2   :  { %v119_v3 = vld [vmem:[%s200_s0 + $0x18] sm:$0x1f]  ;;  %v153_v4 = vsub.f32 0.0, %v8_v0  ;;  %v120_v5 = vld [vmem:[%s200_s0 + $0x20] sm:$0x1f]  ;;  %vm20_vm1 = vcmp.le.f32.partialorder %v117_v1, 0.0 }
   0x3   :  { %vm21_vm2 = vcmp.le.f32.partialorder %v118_v2, 0.0  ;;  %vm23_vm3 = vcmp.le.f32.partialorder %v119_v3, 0.0  ;;  %v161_v6 = vld [vmem:[%s200_s0 + $0x28] sm:$0x1f]  ;;  %vm25_vm7 = vcmp.le.f32.partialorder %v120_v5, 0.0  ;;  %v33_v15 = vmax.f32 %v118_v2, 0.0 }
   0x4   :  { %vm32_vm4 = vcmp.le.f32.partialorder %v153_v4, 2.0  ;;  %v41_v7 = vmax.f32 %v153_v4, 1e-08  ;;  %vm22_vm5 = vmand %vm20_vm1, %vm21_vm2  ;;  %vm27_vm8 = vcmp.le.f32.partialorder %v161_v6, 0.0  ;;  %vm29_vm9 = vcmp.le.f32.partialorder %v153_v4, 1.0 }
   0x5   :  { %v77_v9 = vsel %vm32_vm4, 1.0, %v129_v8  ;;  %vm24_vm6 = vmand %vm22_vm5, %vm23_vm3  ;;  %v35_v16 = vmax.f32 %v119_v3, 0.0  ;;  %v37_v27 = vmax.f32 %v120_v5, 0.0  ;;  %v39_v30 = vmax.f32 %v161_v6, 0.0 }
   0x6   :  { %v42_v10 = vmin.f32 %v41_v7, 1.0  ;;  %v78_v11 = vsel %vm67_vm0, %v77_v9, -inf  ;;  %vm26_vm10 = vmand %vm24_vm6, %vm25_vm7  ;;  %vm75_vm2 = vcmask 8192   ;;  %v62_v54 = vsub.f32 1.0, %v153_v4 }
   0x7   :  { %v79_v12 = vrot.slane %v78_v11, 4  ;;  %vm28_vm11 = vmand %vm26_vm10, %vm27_vm8  ;;  %v36_v26 = vadd.f32 %v35_v16, %v33_v15 }
   0x8   :  { %127 = vrcp.f32 %v42_v10  ;;  %vm30_vm13 = vmxor %vm29_vm9, %vm130_vm12  ;;  %v101_v14 = vsel %vm28_vm11, 1.0, %v129_v8  ;;  %v43_v23 = vmul.f32 0.0, %v42_v10  ;;  %vm51_vm15 = vweird.f32 %v42_v10 }
   0x9   :  { %v80_v13 = vmax.f32 %v78_v11, %v79_v12  ;;  %vm31_vm14 = vmor %vm30_vm13, %vm28_vm11  ;;  %v102_v18 = vsel %vm67_vm0, %v101_v14, inf  ;;  %v55_v33 = vand.u32 2147483647, %v42_v10  ;;  %v57_v34 = vand.u32 2147483648, %v42_v10 }
   0xa   :  { %v89_v17 = vsel %vm31_vm14, 1.0, %v129_v8  ;;  %v103_v22 = vrot.slane %v102_v18, 4  ;;  %v44_v37 = vadd.f32 %v117_v1, %v43_v23  ;;  %v38_v40 = vadd.f32 %v37_v27, %v36_v26 }
   0xb   :  { %v81_v19 = vrot.slane %v80_v13, 2  ;;  %v90_v20 = vsel %vm67_vm0, %v89_v17, inf  ;;  %v58_v44 = vor.u32 1.1754944e-38, %v57_v34  ;;  %vm56_vm6 = vcmp.eq.f32.partialorder %v55_v33, 8.507059e+37 }
   0xc   :  { %v91_v21 = vrot.slane %v90_v20, 4  ;;  %v104_v29 = vmin.f32 %v102_v18, %v103_v22  ;;  %v45_v48 = vmax.f32 %v44_v37, 0.0  ;;  %v40_v50 = vadd.f32 %v39_v30, %v38_v40 }
   0xd   :  { %v82_v24 = vmax.f32 %v80_v13, %v81_v19 }
   0xe   :  { %v128_v25 = vpop.eup %127  ;;  %v92_v28 = vmin.f32 %v90_v20, %v91_v21  ;;  %v105_v36 = vrot.slane %v104_v29, 2  ;;  %vm61_vm9 = vcmp.le.f32.partialorder %v40_v50, 0.0 }
   0xf   :  { %v47_v31 = vmul.f32 %v128_v25, %v42_v10  ;;  %v83_v32 = vrot.slane %v82_v24, 1  ;;  %vm52_vm1 = vweird.f32 %v128_v25 }
  0x10   :  { %v93_v35 = vrot.slane %v92_v28, 2  ;;  %v106_v42 = vmin.f32 %v104_v29, %v105_v36  ;;  %vm53_vm5 = vmor %vm51_vm15, %vm52_vm1 }
  0x11   :  { %v48_v38 = vsub.f32 1.0, %v47_v31  ;;  %v84_v39 = vmax.f32 %v82_v24, %v83_v32 }
  0x12   :  { %v94_v41 = vmin.f32 %v92_v28, %v93_v35  ;;  %v107_v47 = vrot.slane %v106_v42, 1 }
  0x13   :  { %v49_v43 = vmul.f32 %v128_v25, %v48_v38  ;;  %vm85_vm3 = vcmp.gt.f32.partialorder %v84_v39, 0.0 }
  0x14   :  { %v122_v45 = vsel %vm85_vm3, 1.0, %v129_v8  ;;  %v95_v46 = vrot.slane %v94_v41, 1  ;;  %v108_v52 = vmin.f32 %v106_v42, %v107_v47 }
  0x15   :  { %v50_v49 = vadd.f32 %v128_v25, %v49_v43  ;;  %88 = vst.msk [vmem:[%s201_s1 + $0x1] sm:$0x1] %vm75_vm2, %v122_v45 }
  0x16   :  { %v96_v51 = vmin.f32 %v94_v41, %v95_v46  ;;  %vm109_vm8 = vcmp.gt.f32.partialorder %v108_v52, 0.0 }
  0x17   :  { %v54_v53 = vsel %vm53_vm5, %v128_v25, %v50_v49  ;;  %v124_v58 = vsel %vm109_vm8, 1.0, %v129_v8 }
  0x18   :  { %v59_v55 = vsel %vm56_vm6, %v58_v44, %v54_v53  ;;  %vm97_vm7 = vcmp.gt.f32.partialorder %v96_v51, 0.0  ;;  %112 = vst.msk [vmem:[%s201_s1 + $0x3] sm:$0x1] %vm75_vm2, %v124_v58 }
  0x19   :  { %v60_v56 = vmul.f32 %v59_v55, %v45_v48  ;;  %v123_v57 = vsel %vm97_vm7, 1.0, %v129_v8 }
  0x1a   :  { %100 = vst.msk [vmem:[%s201_s1 + $0x2] sm:$0x1] %vm75_vm2, %v123_v57 }
  0x1b   :  { %v63_v59 = vmax.f32 %v60_v56, %v62_v54 }
  0x1d   :  { %v64_v60 = vsel %vm61_vm9, %v60_v56, %v63_v59 }
  0x1e   :  { %v65_v61 = vadd.f32 %v64_v60, %v40_v50 }
  0x20   :  { %v66_v62 = vsel %vm32_vm4, %v65_v61, 0.0 }
  0x21   :  { %v68_v63 = vsel %vm67_vm0, %v66_v62, 0.0 }
  0x22   :  { %v69_v0 = vrot.slane %v68_v63, 4 }
  0x24   :  { %v70_v1 = vadd.f32 %v69_v0, %v68_v63 }
  0x26   :  { %v71_v2 = vrot.slane %v70_v1, 2 }
  0x28   :  { %v72_v3 = vadd.f32 %v71_v2, %v70_v1 }
  0x2a   :  { %v73_v5 = vrot.slane %v72_v3, 1 }
  0x2c   :  { %v74_v6 = vadd.f32 %v73_v5, %v72_v3 }
  0x2e   :  { %76 = vst.msk [vmem:[%s201_s1] sm:$0x1] %vm75_vm2, %v74_v6 }

</bundles_post_ra>
